<compile_context>
chip_gen: v5e
topology: v5e:2x2
jax: 0.10.0
libtpu: 0.0.40
codegen_flags: <defaults>
</compile_context>

<pallas_src>
import jax
import jax.numpy as jnp
from jax.experimental import pallas as pl
from jax.experimental.pallas import tpu as pltpu


def _soft_ce_rows_kernel(yhat_ref, y_ref, loss_ref):
    # yhat_ref, y_ref: (TN, C) tiles.  loss_ref: (TN, 1) per-row losses.
    logits = yhat_ref[...].astype(jnp.float32)          # (TN, C)
    y = y_ref[...].astype(jnp.float32)                  # (TN, C)

    # Numerically stable log-softmax pieces along the class (lane) axis.
    m = jnp.max(logits, axis=1, keepdims=True)          # (TN, 1)
    shifted = logits - m                                 # (TN, C)
    lse = jnp.log(jnp.sum(jnp.exp(shifted), axis=1, keepdims=True))  # (TN, 1)

    # -(y * logp).sum(1) == lse * sum(y) - sum(y * shifted); logp never built.
    y_sum = jnp.sum(y, axis=1, keepdims=True)            # (TN, 1)
    dot = jnp.sum(y * shifted, axis=1, keepdims=True)    # (TN, 1)
    loss_ref[...] = lse * y_sum - dot                     # (TN, 1)


def soft_cross_entropy_loss(y_hat, y, *, max_block_rows=1024,
                            f32_tile_budget_bytes=2 * 1024 * 1024):
    """Pallas implementation of SoftCrossEntropyLoss.forward."""
    assert y_hat.shape == y.shape and y_hat.ndim == 2
    N, C = y_hat.shape

    # Row-tile sizing: big enough to amortize the ~0.35 us per-step overhead,
    # small enough that 2 inputs x 2 double-buffers + f32 temporaries fit VMEM
    # on every generation (v5e/v6e/v7x).
    tn = min(max_block_rows, max(8, f32_tile_budget_bytes // (4 * C)))
    tn = max(8, (tn // 8) * 8)          # sublane dim must be a multiple of 8 ...
    if N <= tn:
        tn = N                          # ... or equal the full array dim.
    grid = (pl.cdiv(N, tn),)
    # TODO(synk): for vocab-scale C (where even an 8-row block overflows VMEM),
    # add a trailing "arbitrary" class-tile grid axis with online logsumexp.

    per_row = pl.pallas_call(
        _soft_ce_rows_kernel,
        out_shape=jax.ShapeDtypeStruct((N, 1), jnp.float32),
        grid_spec=pltpu.PrefetchScalarGridSpec(
            num_scalar_prefetch=0,
            grid=grid,
            in_specs=[
                pl.BlockSpec((tn, C), lambda i: (i, 0)),
                pl.BlockSpec((tn, C), lambda i: (i, 0)),
            ],
            out_specs=pl.BlockSpec((tn, 1), lambda i: (i, 0)),
        ),
        compiler_params=pltpu.CompilerParams(
            dimension_semantics=("parallel",),       # independent row tiles
            vmem_limit_bytes=32 * 1024 * 1024,       # portable v5e/v6e/v7x
        ),
    )(y_hat, y)

    # loss.mean(): O(N) epilogue over one scalar per row.
    return jnp.mean(per_row)


if __name__ == "__main__":
    key = jax.random.PRNGKey(0)
    k1, k2 = jax.random.split(key)

    N, C = 24, 32  # small shapes: batch=24, num_classes=32
    y_hat = jax.random.normal(k1, (N, C), dtype=jnp.float32)
    y_raw = jax.random.uniform(k2, (N, C), dtype=jnp.float32)
    y = y_raw / jnp.sum(y_raw, axis=1, keepdims=True)  # soft targets, rows sum to 1

    def ref_loss(yh, yt):
        logp = jax.nn.log_softmax(yh, axis=1)
        return jnp.mean(-jnp.sum(yt * logp, axis=1))

    # 1) multi-tile path: 8-row blocks -> grid=(3,)
    loss = jax.block_until_ready(soft_cross_entropy_loss(y_hat, y, max_block_rows=8))
    assert jnp.allclose(loss, ref_loss(y_hat, y), atol=1e-5, rtol=1e-5), (loss, ref_loss(y_hat, y))

    # 2) ragged last tile: N=20 with 8-row blocks -> partial final block
    yh2, yt2 = y_hat[:20], y[:20]
    loss2 = jax.block_until_ready(soft_cross_entropy_loss(yh2, yt2, max_block_rows=8))
    assert jnp.allclose(loss2, ref_loss(yh2, yt2), atol=1e-5, rtol=1e-5), (loss2, ref_loss(yh2, yt2))

    # 3) single-tile path with default sizing (block == full array)
    loss3 = jax.block_until_ready(soft_cross_entropy_loss(y_hat, y))
    assert jnp.allclose(loss3, ref_loss(y_hat, y), atol=1e-5, rtol=1e-5), (loss3, ref_loss(y_hat, y))

    print("KERNEL_OK")
</pallas_src>

<mosaic_0001>
module attributes {stable_mosaic.version = 11 : i64} {
  func.func @_soft_ce_rows_kernel(%arg0: i32, %arg1: memref<8x32xf32, #tpu.memory_space<vmem>>, %arg2: memref<8x32xf32, #tpu.memory_space<vmem>>, %arg3: memref<8x1xf32, #tpu.memory_space<vmem>>) attributes {dimension_semantics = [#tpu.dimension_semantics<parallel>], iteration_bounds = array<i64: 3>, scalar_prefetch = 0 : i64, scratch_operands = 0 : i64, tpu.core_type = #tpu.core_type<tc>, window_params = [{transform_indices = @transform_0, window_bounds = array<i64: 8, 32>}, {transform_indices = @transform_1, window_bounds = array<i64: 8, 32>}, {transform_indices = @transform_2, window_bounds = array<i64: 8, 1>}]} {
    %c0 = arith.constant 0 : index
    %c0_0 = arith.constant 0 : index
    %0 = vector.load %arg1[%c0, %c0_0] : memref<8x32xf32, #tpu.memory_space<vmem>>, vector<8x32xf32>
    %c0_1 = arith.constant 0 : index
    %c0_2 = arith.constant 0 : index
    %1 = vector.load %arg2[%c0_1, %c0_2] : memref<8x32xf32, #tpu.memory_space<vmem>>, vector<8x32xf32>
    %cst = arith.constant dense<0xFF800000> : vector<8xf32>
    %2 = vector.multi_reduction <maximumf>, %0, %cst [1] : vector<8x32xf32> to vector<8xf32>
    %3 = vector.shape_cast %2 : vector<8xf32> to vector<8x1xf32>
    %4 = vector.broadcast %3 : vector<8x1xf32> to vector<8x32xf32>
    %5 = arith.subf %0, %4 : vector<8x32xf32>
    %6 = math.exp %5 : vector<8x32xf32>
    %cst_3 = arith.constant dense<0.000000e+00> : vector<8xf32>
    %7 = vector.multi_reduction <add>, %6, %cst_3 [1] : vector<8x32xf32> to vector<8xf32>
    %8 = vector.shape_cast %7 : vector<8xf32> to vector<8x1xf32>
    %9 = math.log %8 : vector<8x1xf32>
    %cst_4 = arith.constant dense<0.000000e+00> : vector<8xf32>
    %10 = vector.multi_reduction <add>, %1, %cst_4 [1] : vector<8x32xf32> to vector<8xf32>
    %11 = vector.shape_cast %10 : vector<8xf32> to vector<8x1xf32>
    %12 = arith.mulf %1, %5 : vector<8x32xf32>
    %cst_5 = arith.constant dense<0.000000e+00> : vector<8xf32>
    %13 = vector.multi_reduction <add>, %12, %cst_5 [1] : vector<8x32xf32> to vector<8xf32>
    %14 = vector.shape_cast %13 : vector<8xf32> to vector<8x1xf32>
    %15 = arith.mulf %9, %11 : vector<8x1xf32>
    %16 = arith.subf %15, %14 : vector<8x1xf32>
    %c0_6 = arith.constant 0 : index
    %c0_7 = arith.constant 0 : index
    %17 = vector.load %arg3[%c0_6, %c0_7] : memref<8x1xf32, #tpu.memory_space<vmem>>, vector<8x1xf32>
    tpu.vector_store %arg3[%c0_6, %c0_7], %16 {strides = array<i32>} : memref<8x1xf32, #tpu.memory_space<vmem>>, vector<8x1xf32>,
    return
  }
  func.func @transform_0(%arg0: i32) -> (i32, i32) {
    %c0_i32 = arith.constant 0 : i32
    %c0_i32_0 = arith.constant 0 : i32
    return %arg0, %c0_i32 : i32, i32
  }
  func.func @transform_1(%arg0: i32) -> (i32, i32) {
    %c0_i32 = arith.constant 0 : i32
    %c0_i32_0 = arith.constant 0 : i32
    return %arg0, %c0_i32 : i32, i32
  }
  func.func @transform_2(%arg0: i32) -> (i32, i32) {
    %c0_i32 = arith.constant 0 : i32
    %c0_i32_0 = arith.constant 0 : i32
    return %arg0, %c0_i32 : i32, i32
  }
}

</mosaic_0001>

<bundles_post_ra>
// kernel: tpu_custom_call.1
= control target key start
LH: loop header
LB: loop body
LE: loop exit
PB: predicated region body
PF: predicated region fallthrough
CT: control target
= control target key end

     0   :  { %7 = vsyncpa [#allocation3], 0  ;;  %s615_s0 = inlined_call_operand.hbm [shape: f32[24,32], index: 0, kind: input, shape index: {}]   ;;  %s616_s1 = inlined_call_operand.hbm [shape: f32[24,32], index: 1, kind: input, shape index: {}]   ;;  %s617_s2 = inlined_call_operand.vmem [shape: f32[24,1], index: 2, kind: output, shape index: {}]  }
   0x1   :  { %9 = vsyncpa [#allocation3 + $0x1], 0 }
   0x2   :  { %10 = vsyncpa [#allocation5], 0 }
   0x3   :  { %12 = vsyncpa [#allocation5 + $0x1], 0  ;;  %s489_s9 = smov 0   ;;  %s491_s10 = smov 0  }
   0x4   :  { %s493_s11 = smov 0   ;;  %s495_s12 = smov 0  }
   0x5 LB: > { %s508_s13 = sadd.s32 4294967295, %s472_s12   ;;  %s511_s14 = sadd.s32 1, %s472_s12   ;;  %s472_s12 = sphi %s495_s12, %s625_s12   ;;  %s468_s11 = sphi %s493_s11, %s624_s11   ;;  %s464_s10 = sphi %s491_s10, %s623_s10   ;;  %s460_s9 = sphi %s489_s9, %s622_s9  }
   0x6   : > { %s22_s15 = ssub.s32 %s472_s12, %s511_s14  ;;  %s25_s16 = sadd.s32 1, %s468_s11 }
   0x7   : > { %p23_p0 = scmp.eq.s32.totalorder %s22_s15, 0  ;;  %p32_p1 = scmp.ne.s32.totalorder %s468_s11, %s464_s10 }
   0x8   : > { %p33_p2 = scmp.eq.s32.totalorder %s472_s12, 0  ;;  %p38_p3 = scmp.ne.s32.totalorder %s464_s10, %s460_s9 }
   0x9   : > { %s521_s17 = scalar_select %p23_p0, %s468_s11, %s25_s16  }
   0xa   : > { %p523_p4 = por %p33_p2, %p32_p1  ;;  %p39_p5 = scmp.eq.s32.totalorder %s508_s13, 0 }
   0xb   : > { %p337_p6 = scmp.lt.s32.totalorder %s472_s12, 3  ;;  %s534_s20 = sand.u32 1, %s468_s11  }
   0xc   : > { %p529_p7 = por %p39_p5, %p38_p3  ;;  %s316_s21 = sshll.u32 %s534_s20, 3 }
   0xd   : > { %s317_s22 = sshll.u32 %s472_s12, 3  ;;  %s118_s26 = scalar_lea.vmem [#allocation2], %s316_s21 }
   0xe   : > { %s122_s25 = scalar_lea.hbm %s615_s0, %s317_s22  ;;  %s126_s27 = sshll.u32 %s118_s26, 4  ;;  %s127_s27 = int_to_ptr.vmem [resolvable:$true] %s126_s27 }
   0xf   : > { %s124_s28 = sshll.u32 %s122_s25, 4  ;;  %p543_p8 = pnand %p337_p6, %p523_p4  ;;  %s125_s28 = int_to_ptr.hbm [resolvable:$true] %s124_s28 }
  0x10   : > { %p320_p9 = scmp.ge.s32.totalorder %s472_s12, 1  ;;  %p150_p10 = scmp.lt.s32.totalorder %s472_s12, 4 }
  0x11   : > { %s115_s30 = scalar_lea.sflag [#allocation3], %s534_s20  ;;  %s374_s3 = sshra.s32 %s125_s28, 4  ;;  %s375_s3 = int_to_ptr.hbm [resolvable:$true] %s374_s3 }
  0x12   : > { %s376_s4 = scalar_lea.hbm %s375_s3, 8  ;;  %p378_p12 = pneg %p543_p8 }
  0x13   : > { %p377_p11 = scmp.ne.s32.totalorder %s375_s3, %s376_s4  ;;  %s381_s7 = scalar_lea.hbm %s615_s0, 24 }
  0x14   : > { %p382_p1 = scmp.lt.s32.totalorder %s375_s3, %s615_s0  ;;  %p383_p2 = scmp.lt.s32.totalorder %s381_s7, %s376_s4 }
  0x15   : > { %p379_p13 = pnand %p378_p12, %p377_p11 }
  0x16   : > { %p384_p3 = por %p383_p2, %p382_p1 }
  0x17   : > { %p380_p0 = pneg %p379_p13 }
  0x19   : > { %p385_p4 = pnand %p384_p3, %p380_p0 }
  0x1b   : > { %388 = shalt.err (!%p385_p4)
}
  0x1c   : > { %333 = dma.hbm_to_vmem [thread:$0]  (!%p543_p8), %s125_s28, 128, %s127_s27, %s115_s30  }
  0x1d   : > { %p567_p5 = pnand %p320_p9, %p150_p10  ;;  %s141_s23 = scalar_lea.hbm %s616_s1, %s317_s22 }
  0x1e   : > { %s137_s24 = scalar_lea.vmem [#allocation4], %s316_s21  ;;  %s143_s26 = sshll.u32 %s141_s23, 4  ;;  %s144_s26 = int_to_ptr.hbm [resolvable:$true] %s143_s26 }
  0x1f   : > { %s145_s25 = sshll.u32 %s137_s24, 4  ;;  %s134_s3 = scalar_lea.sflag [#allocation5], %s534_s20  ;;  %s146_s25 = int_to_ptr.vmem [resolvable:$true] %s145_s25 }
  0x20   : > { %s404_s4 = sshra.s32 %s144_s26, 4  ;;  %s411_s28 = scalar_lea.hbm %s616_s1, 24  ;;  %s405_s4 = int_to_ptr.hbm [resolvable:$true] %s404_s4 }
  0x21   : > { %s406_s5 = scalar_lea.hbm %s405_s4, 8  ;;  %p412_p11 = scmp.lt.s32.totalorder %s405_s4, %s616_s1 }
  0x22   : > { %p407_p6 = scmp.ne.s32.totalorder %s405_s4, %s406_s5  ;;  %p413_p13 = scmp.lt.s32.totalorder %s411_s28, %s406_s5 }
  0x24   : > { %p409_p9 = pnand %p407_p6, %p378_p12  ;;  %p414_p0 = por %p413_p13, %p412_p11 }
  0x26   : > { %p410_p10 = pneg %p409_p9 }
  0x28   : > { %p415_p1 = pnand %p414_p0, %p410_p10 }
  0x2a   : > { %418 = shalt.err (!%p415_p1)
}
  0x2b   : > { %336 = dma.hbm_to_vmem [thread:$0]  (!%p543_p8), %s144_s26, 128, %s146_s25, %s134_s3  }
  0x2c   : > { %154 = sbr.rel (%p567_p5) target bundleno = 312 (0x138), region = 28  ;;  %s156_s20 = sand.u32 (!%p567_p5), 1, %s464_s10  }
  0x2d   : > { %s321_s21 = sshll.u32 (!%p567_p5), %s156_s20, 3  ;;  %s157_s6 = scalar_lea.sflag (!%p567_p5), [#allocation3], %s156_s20 }
  0x2e   : > { %s160_s7 = scalar_lea.vmem (!%p567_p5), [#allocation2], %s321_s21 }
  0x31   : > { %451 = dma.done.wait (%p529_p7), %s157_s6, 128  }
  0x32   : > { %453 = vsyncadd (%p529_p7), %s157_s6, 4294967168  ;;  %s167_s8 = scalar_lea.sflag [#allocation5], %s156_s20  ;;  %s170_s9 = scalar_lea.vmem [#allocation4], %s321_s21 }
  0x33   : > { %455 = dma.done.wait (%p529_p7), %s167_s8, 128  }
  0x34   : > { %457 = vsyncadd (%p529_p7), %s167_s8, 4294967168  ;;  %vm202_vm0 = vcmask 261120   ;;  %v200_v0 = vld [vmem:[%s160_s7] sm:$0xff]  ;;  %v201_v1 = vld [vmem:[%s170_s9] sm:$0xff]  ;;  %p196_p7 = scmp.lt.s32.totalorder %s508_s13, 2  ;;  %vm223_vm1 = vcmask 7168  }
  0x35   : > { %v203_v2 = vsel %vm202_vm0, %v200_v0, -inf  ;;  %v214_v3 = vsel %vm202_vm0, %v201_v1, 0.0 }
  0x36   : > { %204 = vmax.xlane.f32.xlu0 %v203_v2  ;;  %215 = vadd.xlane.f32.xlu1 %v214_v3  ;;  %s627_s13 = smov (!%p196_p7, %s508_s13), 2 }
  0x37   : > { %s323_s19 = sshll.u32 %s627_s13, 3 }
  0x38   : > { %s199_s16 = scalar_lea.vmem %s617_s2, %s323_s19 }
  0xa9   : > { %v205_v4 = vpop.xlane.xlu0 %204  ;;  %v216_v12 = vpop.xlane.xlu1 %215 }
  0xaa   : > { %v206_v5 = vsub.f32 %v200_v0, %v205_v4 }
  0xac   : > { %v207_v6 = vmul.f32 1.442695, %v206_v5  ;;  %v217_v7 = vmul.f32 %v206_v5, %v201_v1 }
  0xae   : > { %370 = vpow2.f32 %v207_v6  ;;  %v218_v8 = vsel %vm202_vm0, %v217_v7, 0.0 }
  0xaf   : > { %219 = vadd.xlane.f32.xlu1 %v218_v8 }
  0xb4   : > { %v371_v9 = vpop.eup %370 }
  0xb5   : > { %v209_v10 = vsel %vm202_vm0, %v371_v9, 0.0 }
  0xb6   : > { %210 = vadd.xlane.f32.xlu0 %v209_v10 }
 0x122   : > { %v220_v16 = vpop.xlane.xlu1 %219 }
 0x129   : > { %v211_v11 = vpop.xlane.xlu0 %210 }
 0x12a   : > { %372 = vlog2.f32 %v211_v11 }
 0x130   : > { %v373_v13 = vpop.eup %372 }
 0x131   : > { %v213_v14 = vmul.f32 0.6931472, %v373_v13 }
 0x133   : > { %v221_v15 = vmul.f32 %v216_v12, %v213_v14 }
 0x135   : > { %v222_v17 = vsub.f32 %v221_v15, %v220_v16 }
 0x137   : > { %224 = vst.msk [vmem:[%s199_s16] sm:$0xff] %vm223_vm1, %v222_v17 }
 0x138 PF: > { %p15_p8 = scmp.ge.s32.totalorder %s511_s14, 5   ;;  %s622_s9 = smov %s464_s10 }
 0x139   : > { %s623_s10 = smov %s468_s11  ;;  %s624_s11 = smov %s521_s17 }
 0x13a   : > { %s625_s12 = smov %s511_s14  ;;  %17 = sbr.rel (!%p15_p8) target bundleno = 5 (0x5), region = 81 }
 0x13f   :  { %244 = vsyncpa [#allocation3], 1 }
 0x140   :  { %246 = vsyncpa [#allocation3 + $0x1], 1 }
 0x141   :  { %247 = vsyncpa [#allocation5], 1 }
 0x142   :  { %249 = vsyncpa [#allocation5 + $0x1], 1 }

</bundles_post_ra>
